<compile_context>
chip_gen: v7x
topology: tpu7x:2x2x1
jax: 0.10.0
libtpu: 0.0.40
codegen_flags: <defaults>
</compile_context>

<pallas_src>
import math

import jax
import jax.numpy as jnp
from jax.experimental import pallas as pl
from jax.experimental.pallas import tpu as pltpu


LANE = 128        # hidden feature dims padded to multiples of this (MXU lanes)
SUBLANE = 8       # batch tiles padded to multiples of this (vreg sublanes)
MAX_TILE_B = 1024  # upper bound on batch rows per grid step


def _round_up(n, m):
    return ((n + m - 1) // m) * m


def _choose_tile(batch, max_tile=MAX_TILE_B):
    """Pick (tile_b, batch_padded).

    Whole-batch single tile for tiny rollouts; otherwise aim for >= 2 grid
    steps (v7x megacore via "parallel" semantics) with tiles as large as
    possible (capped at max_tile) to amortize per-grid-step overhead.
    """
    if batch <= 2 * SUBLANE:
        tile = _round_up(batch, SUBLANE)
        return tile, tile
    tile = min(max_tile, _round_up(pl.cdiv(batch, 2), SUBLANE))
    return tile, _round_up(batch, tile)


# ---------------------------------------------------------------------------
# Kernel
# ---------------------------------------------------------------------------
def _make_policy_kernel(num_layers: int, max_action: float):
    """MLP: (num_layers - 1) x (linear + ReLU), then linear + tanh * max_action.

    refs = (x_ref, w_0, b_0, ..., w_{L-1}, b_{L-1}, out_ref).
    Weights are bf16 (in, out); biases f32 (1, out).  Activations go bf16 into
    the MXU with f32 accumulation; element-wise math stays f32.
    """

    def kernel(*refs):
        x_ref = refs[0]
        out_ref = refs[-1]
        p = refs[1:-1]

        h = x_ref[...].astype(jnp.bfloat16)              # (tile_b, in_dim)
        for i in range(num_layers - 1):
            w = p[2 * i][...]                            # bf16 (k, n_pad)
            b = p[2 * i + 1][...]                        # f32  (1, n_pad)
            acc = jnp.dot(h, w, preferred_element_type=jnp.float32) + b
            h = jnp.maximum(acc, 0.0).astype(jnp.bfloat16)
        w = p[-2][...]                                   # bf16 (h_pad, out_size)
        b = p[-1][...]                                   # f32  (1, out_size)
        a = jnp.dot(h, w, preferred_element_type=jnp.float32) + b
        out_ref[...] = jnp.tanh(a) * jnp.float32(max_action)

    return kernel


# ---------------------------------------------------------------------------
# Parameter preparation
# ---------------------------------------------------------------------------
def prepare_params(params_f32):
    """params_f32: flat [w1, b1, ..., w_act, b_act]; w is (in, out) f32.

    Hidden feature dims are zero-padded to 128-lane multiples (exact: padded
    weight rows/cols and biases are 0, ReLU keeps padded activations at 0).
    The first layer keeps its true input width and the head keeps its true
    output width, so neither the input read nor the output write is padded.
    Returns (padded_params, true_layer_sizes).
    """
    num_layers = len(params_f32) // 2
    padded = []
    true_sizes = [int(params_f32[0].shape[0])]
    for j in range(num_layers):
        w = params_f32[2 * j]
        b = params_f32[2 * j + 1].reshape(1, -1)
        in_true, out_true = int(w.shape[0]), int(w.shape[1])
        true_sizes.append(out_true)
        in_p = in_true if j == 0 else _round_up(in_true, LANE)
        out_p = out_true if j == num_layers - 1 else _round_up(out_true, LANE)
        w_p = jnp.zeros((in_p, out_p), jnp.bfloat16)
        w_p = w_p.at[:in_true, :out_true].set(w.astype(jnp.bfloat16))
        b_p = jnp.zeros((1, out_p), jnp.float32)
        b_p = b_p.at[:, :out_true].set(b.astype(jnp.float32))
        padded += [w_p, b_p]
    return padded, true_sizes


# ---------------------------------------------------------------------------
# Forward wrapper
# ---------------------------------------------------------------------------
def deterministic_dnn_policy_forward(x, padded_params, true_sizes, max_action,
                                     *, max_tile=MAX_TILE_B):
    """x: (batch, input_size) f32 -> (batch, output_size) f32 actions."""
    num_layers = len(padded_params) // 2
    batch, in_dim = x.shape
    out_size = true_sizes[-1]

    tile_b, batch_p = _choose_tile(batch, max_tile)
    if batch_p != batch:
        # Batch-only zero pad (single XLA op); no feature-axis pre-padding.
        x = jnp.pad(x, ((0, batch_p - batch), (0, 0)))

    kernel = _make_policy_kernel(num_layers, max_action)
    grid = (batch_p // tile_b,)

    # Input tiles stream at true feature width (block last dim == array dim).
    x_spec = pl.BlockSpec((tile_b, in_dim), lambda i: (i, 0))
    # Narrow output: only the true action columns are written back.
    out_spec = pl.BlockSpec((tile_b, out_size), lambda i: (i, 0))
    # Constant block index => params DMA'd once, VMEM-resident across steps.
    # (All params are 2-D.)
    param_specs = [pl.BlockSpec(p.shape, lambda i: (0, 0)) for p in padded_params]

    # Honest scheduler hint: true (unpadded) dims.
    flops = 2 * batch * sum(true_sizes[j] * true_sizes[j + 1] for j in range(num_layers))
    bytes_accessed = (
        batch * in_dim * 4
        + sum(2 * true_sizes[j] * true_sizes[j + 1] + 4 * true_sizes[j + 1]
              for j in range(num_layers))
        + batch * out_size * 4
    )
    cost = pl.CostEstimate(flops=flops, transcendentals=batch * out_size,
                           bytes_accessed=bytes_accessed)

    out = pl.pallas_call(
        kernel,
        out_shape=jax.ShapeDtypeStruct((batch_p, out_size), jnp.float32),
        grid=grid,
        in_specs=[x_spec] + param_specs,
        out_specs=out_spec,
        compiler_params=pltpu.CompilerParams(
            dimension_semantics=("parallel",),   # shard batch tiles across TCs
        ),
        cost_estimate=cost,
    )(x, *padded_params)

    if batch_p != batch:
        out = out[:batch]
    return out


# ---------------------------------------------------------------------------
# Init mirroring the PyTorch module (xavier_uniform gain=sqrt(2), zero bias)
# ---------------------------------------------------------------------------
def init_policy_params(key, input_size, output_size, hidden_sizes):
    layer_sizes = (input_size,) + tuple(hidden_sizes) + (output_size,)
    params = []
    gain = math.sqrt(2.0)
    for i in range(len(layer_sizes) - 1):
        fan_in, fan_out = layer_sizes[i], layer_sizes[i + 1]
        key, sub = jax.random.split(key)
        bound = gain * math.sqrt(6.0 / (fan_in + fan_out))
        # Stored as (in, out) — transpose of PyTorch's (out, in) layout.
        w = jax.random.uniform(
            sub, (fan_in, fan_out), dtype=jnp.float32, minval=-bound, maxval=bound
        )
        b = jnp.zeros((fan_out,), dtype=jnp.float32)
        params += [w, b]
    return params


# ---------------------------------------------------------------------------
# References for verification
# ---------------------------------------------------------------------------
def reference_forward_f32(x, params_f32, max_action):
    """Pure-f32 reference of the PyTorch forward (semantic check)."""
    n_hidden = len(params_f32) // 2 - 1
    h = x.astype(jnp.float32)
    for i in range(n_hidden):
        h = jnp.maximum(h @ params_f32[2 * i] + params_f32[2 * i + 1].reshape(1, -1), 0.0)
    a = h @ params_f32[-2] + params_f32[-1].reshape(1, -1)
    return jnp.tanh(a) * max_action


def reference_forward_bf16(x, params_f32, max_action):
    """Reference with the same bf16-in / f32-accumulate scheme as the kernel."""
    n_hidden = len(params_f32) // 2 - 1
    h = x.astype(jnp.bfloat16)
    for i in range(n_hidden):
        w = params_f32[2 * i].astype(jnp.bfloat16)
        b = params_f32[2 * i + 1].reshape(1, -1).astype(jnp.float32)
        acc = jnp.dot(h, w, preferred_element_type=jnp.float32) + b
        h = jnp.maximum(acc, 0.0).astype(jnp.bfloat16)
    w = params_f32[-2].astype(jnp.bfloat16)
    b = params_f32[-1].reshape(1, -1).astype(jnp.float32)
    a = jnp.dot(h, w, preferred_element_type=jnp.float32) + b
    return jnp.tanh(a) * max_action


if __name__ == "__main__":
    # Flat observation -> action.  batch=256 gives two 128-row tiles, which
    # exercises the multi-step ("parallel") grid path while staying small.
    batch = 256
    input_size = 32
    hidden_sizes = (64, 64)
    output_size = 8
    max_action = 2.0

    key = jax.random.PRNGKey(0)
    key, xk = jax.random.split(key)
    x = jax.random.normal(xk, (batch, input_size), dtype=jnp.float32)

    params_f32 = init_policy_params(key, input_size, output_size, hidden_sizes)
    padded_params, true_sizes = prepare_params(params_f32)

    action = deterministic_dnn_policy_forward(x, padded_params, true_sizes, max_action)
    action = jax.block_until_ready(action)

    assert action.shape == (batch, output_size)

    # Tight check vs a reference using the kernel's bf16/f32 numerics.
    ref_bf16 = reference_forward_bf16(x, params_f32, max_action)
    assert jnp.allclose(action, ref_bf16, atol=2e-3, rtol=2e-3), "mismatch vs bf16 reference"

    # Looser semantic check vs the pure-f32 PyTorch-equivalent forward.
    ref_f32 = reference_forward_f32(x, params_f32, max_action)
    assert jnp.allclose(action, ref_f32, atol=8e-2, rtol=5e-2), "mismatch vs f32 reference"

    # TODO(synk): get_exploration_action (Normal sampling) is not part of
    # forward(); it could be added with pltpu.prng_seed + pltpu.stateful_normal.
    print("KERNEL_OK")
</pallas_src>

<mosaic_0001>
module attributes {stable_mosaic.version = 11 : i64} {
  func.func @kernel(%arg0: i32, %arg1: memref<128x32xf32, #tpu.memory_space<vmem>>, %arg2: memref<32x128xbf16, #tpu.memory_space<vmem>>, %arg3: memref<1x128xf32, #tpu.memory_space<vmem>>, %arg4: memref<128x128xbf16, #tpu.memory_space<vmem>>, %arg5: memref<1x128xf32, #tpu.memory_space<vmem>>, %arg6: memref<128x8xbf16, #tpu.memory_space<vmem>>, %arg7: memref<1x8xf32, #tpu.memory_space<vmem>>, %arg8: memref<128x8xf32, #tpu.memory_space<vmem>>) attributes {dimension_semantics = [#tpu.dimension_semantics<parallel>], iteration_bounds = array<i64: 2>, scalar_prefetch = 0 : i64, scratch_operands = 0 : i64, tpu.core_type = #tpu.core_type<tc>, window_params = [{transform_indices = @transform_0, window_bounds = array<i64: 128, 32>}, {pipeline_mode = #tpu.pipeline_mode<synchronous>, transform_indices = @transform_1, window_bounds = array<i64: 32, 128>}, {pipeline_mode = #tpu.pipeline_mode<synchronous>, transform_indices = @transform_2, window_bounds = array<i64: 1, 128>}, {pipeline_mode = #tpu.pipeline_mode<synchronous>, transform_indices = @transform_3, window_bounds = array<i64: 128, 128>}, {pipeline_mode = #tpu.pipeline_mode<synchronous>, transform_indices = @transform_4, window_bounds = array<i64: 1, 128>}, {pipeline_mode = #tpu.pipeline_mode<synchronous>, transform_indices = @transform_5, window_bounds = array<i64: 128, 8>}, {pipeline_mode = #tpu.pipeline_mode<synchronous>, transform_indices = @transform_6, window_bounds = array<i64: 1, 8>}, {transform_indices = @transform_7, window_bounds = array<i64: 128, 8>}]} {
    %c0 = arith.constant 0 : index
    %c0_0 = arith.constant 0 : index
    %0 = vector.load %arg1[%c0, %c0_0] : memref<128x32xf32, #tpu.memory_space<vmem>>, vector<128x32xf32>
    %1 = arith.truncf %0 : vector<128x32xf32> to vector<128x32xbf16>
    %c0_1 = arith.constant 0 : index
    %c0_2 = arith.constant 0 : index
    %2 = vector.load %arg2[%c0_1, %c0_2] : memref<32x128xbf16, #tpu.memory_space<vmem>>, vector<32x128xbf16>
    %c0_3 = arith.constant 0 : index
    %c0_4 = arith.constant 0 : index
    %3 = vector.load %arg3[%c0_3, %c0_4] : memref<1x128xf32, #tpu.memory_space<vmem>>, vector<1x128xf32>
    %cst = arith.constant dense<0.000000e+00> : vector<128x128xf32>
    %4 = tpu.matmul %1, %2, %cst {dimension_numbers = #tpu.dot_dimension_numbers<[1], [0], [0], [1], [0, 0, 1, 1], [], []>} : vector<128x32xbf16>, vector<32x128xbf16>, vector<128x128xf32> -> vector<128x128xf32>
    %5 = vector.broadcast %3 : vector<1x128xf32> to vector<128x128xf32>
    %6 = arith.addf %4, %5 : vector<128x128xf32>
    %cst_5 = arith.constant 0.000000e+00 : f32
    %7 = vector.broadcast %cst_5 : f32 to vector<128x128xf32>
    %8 = arith.maximumf %6, %7 : vector<128x128xf32>
    %9 = arith.truncf %8 : vector<128x128xf32> to vector<128x128xbf16>
    %c0_6 = arith.constant 0 : index
    %c0_7 = arith.constant 0 : index
    %10 = vector.load %arg4[%c0_6, %c0_7] : memref<128x128xbf16, #tpu.memory_space<vmem>>, vector<128x128xbf16>
    %c0_8 = arith.constant 0 : index
    %c0_9 = arith.constant 0 : index
    %11 = vector.load %arg5[%c0_8, %c0_9] : memref<1x128xf32, #tpu.memory_space<vmem>>, vector<1x128xf32>
    %cst_10 = arith.constant dense<0.000000e+00> : vector<128x128xf32>
    %12 = tpu.matmul %9, %10, %cst_10 {dimension_numbers = #tpu.dot_dimension_numbers<[1], [0], [0], [1], [0, 0, 1, 1], [], []>} : vector<128x128xbf16>, vector<128x128xbf16>, vector<128x128xf32> -> vector<128x128xf32>
    %13 = vector.broadcast %11 : vector<1x128xf32> to vector<128x128xf32>
    %14 = arith.addf %12, %13 : vector<128x128xf32>
    %cst_11 = arith.constant 0.000000e+00 : f32
    %15 = vector.broadcast %cst_11 : f32 to vector<128x128xf32>
    %16 = arith.maximumf %14, %15 : vector<128x128xf32>
    %17 = arith.truncf %16 : vector<128x128xf32> to vector<128x128xbf16>
    %c0_12 = arith.constant 0 : index
    %c0_13 = arith.constant 0 : index
    %18 = vector.load %arg6[%c0_12, %c0_13] : memref<128x8xbf16, #tpu.memory_space<vmem>>, vector<128x8xbf16>
    %c0_14 = arith.constant 0 : index
    %c0_15 = arith.constant 0 : index
    %19 = vector.load %arg7[%c0_14, %c0_15] : memref<1x8xf32, #tpu.memory_space<vmem>>, vector<1x8xf32>
    %cst_16 = arith.constant dense<0.000000e+00> : vector<128x8xf32>
    %20 = tpu.matmul %17, %18, %cst_16 {dimension_numbers = #tpu.dot_dimension_numbers<[1], [0], [0], [1], [0, 0, 1, 1], [], []>} : vector<128x128xbf16>, vector<128x8xbf16>, vector<128x8xf32> -> vector<128x8xf32>
    %21 = vector.broadcast %19 : vector<1x8xf32> to vector<128x8xf32>
    %22 = arith.addf %20, %21 : vector<128x8xf32>
    %23 = math.tanh %22 : vector<128x8xf32>
    %cst_17 = arith.constant 2.000000e+00 : f32
    %24 = vector.broadcast %cst_17 : f32 to vector<128x8xf32>
    %25 = arith.mulf %23, %24 : vector<128x8xf32>
    %c0_18 = arith.constant 0 : index
    %c0_19 = arith.constant 0 : index
    %26 = vector.load %arg8[%c0_18, %c0_19] : memref<128x8xf32, #tpu.memory_space<vmem>>, vector<128x8xf32>
    tpu.vector_store %arg8[%c0_18, %c0_19], %25 {strides = array<i32>} : memref<128x8xf32, #tpu.memory_space<vmem>>, vector<128x8xf32>,
    return
  }
  func.func @transform_0(%arg0: i32) -> (i32, i32) {
    %c0_i32 = arith.constant 0 : i32
    %c0_i32_0 = arith.constant 0 : i32
    return %arg0, %c0_i32 : i32, i32
  }
  func.func @transform_1(%arg0: i32) -> (i32, i32) {
    %c0_i32 = arith.constant 0 : i32
    %c0_i32_0 = arith.constant 0 : i32
    %c0_i32_1 = arith.constant 0 : i32
    return %c0_i32, %c0_i32_0 : i32, i32
  }
  func.func @transform_2(%arg0: i32) -> (i32, i32) {
    %c0_i32 = arith.constant 0 : i32
    %c0_i32_0 = arith.constant 0 : i32
    %c0_i32_1 = arith.constant 0 : i32
    return %c0_i32, %c0_i32_0 : i32, i32
  }
  func.func @transform_3(%arg0: i32) -> (i32, i32) {
    %c0_i32 = arith.constant 0 : i32
    %c0_i32_0 = arith.constant 0 : i32
    %c0_i32_1 = arith.constant 0 : i32
    return %c0_i32, %c0_i32_0 : i32, i32
  }
  func.func @transform_4(%arg0: i32) -> (i32, i32) {
    %c0_i32 = arith.constant 0 : i32
    %c0_i32_0 = arith.constant 0 : i32
    %c0_i32_1 = arith.constant 0 : i32
    return %c0_i32, %c0_i32_0 : i32, i32
  }
  func.func @transform_5(%arg0: i32) -> (i32, i32) {
    %c0_i32 = arith.constant 0 : i32
    %c0_i32_0 = arith.constant 0 : i32
    %c0_i32_1 = arith.constant 0 : i32
    return %c0_i32, %c0_i32_0 : i32, i32
  }
  func.func @transform_6(%arg0: i32) -> (i32, i32) {
    %c0_i32 = arith.constant 0 : i32
    %c0_i32_0 = arith.constant 0 : i32
    %c0_i32_1 = arith.constant 0 : i32
    return %c0_i32, %c0_i32_0 : i32, i32
  }
  func.func @transform_7(%arg0: i32) -> (i32, i32) {
    %c0_i32 = arith.constant 0 : i32
    %c0_i32_0 = arith.constant 0 : i32
    return %arg0, %c0_i32 : i32, i32
  }
}

</mosaic_0001>

<bundles_post_ra>
// kernel: tpu_custom_call.1
= control target key start
LH: loop header
LB: loop body
LE: loop exit
PB: predicated region body
PF: predicated region fallthrough
CT: control target
= control target key end

     0   :  { %s1213_s24 = smov 0   ;;  %s1378_s0 = inlined_call_operand.vmem [shape: f32[256,32], index: 0, kind: input, shape index: {}]   ;;  %s1379_s1 = inlined_call_operand.vmem [shape: bf16[32,128], index: 1, kind: input, shape index: {}]   ;;  %s1380_s2 = inlined_call_operand.vmem [shape: f32[1,128], index: 2, kind: input, shape index: {}]   ;;  %s1381_s3 = inlined_call_operand.vmem [shape: bf16[128,128], index: 3, kind: input, shape index: {}]   ;;  %s1382_s4 = inlined_call_operand.vmem [shape: f32[1,128], index: 4, kind: input, shape index: {}]   ;;  %s1383_s5 = inlined_call_operand.vmem [shape: bf16[128,8], index: 5, kind: input, shape index: {}]   ;;  %s1384_s6 = inlined_call_operand.vmem [shape: f32[1,8], index: 6, kind: input, shape index: {}]   ;;  %s1385_s7 = inlined_call_operand.vmem [shape: f32[256,8], index: 7, kind: output, shape index: {}]  }
   0x1 LB: > { %s941_s25 = sadd.s32 4294967295, %s1171_s24   ;;  %p945_p0 = scmp.ge.s32.totalorder %s1171_s24, 1  ;;  %s1171_s24 = sphi %s1213_s24, %s17_s24  }
   0x2   : > { %p238_p1 = scmp.lt.s32.totalorder %s1171_s24, 3 }
   0x4   : > { %p239_p2 = pnand %p945_p0, %p238_p1 }
   0x5   : > { %v1115_v0 = vld [vmem:[%s1379_s1] sm:$0xff] (!%p239_p2)   ;;  %s946_s28 = sshll.u32 (!%p239_p2), %s941_s25, 4  ;;  %v1116_v1 = vld [vmem:[%s1379_s1 + $0x8] sm:$0xff] (!%p239_p2)   ;;  %v1119_v4 = vld [vmem:[%s1381_s3 + $0x10] sm:$0xff] (!%p239_p2)   ;;  %vm330_vm0 = vcmask (!%p239_p2), 261120   ;;  %vm868_vm1 = vcmask (!%p239_p2), 64512  }
   0x6   : > { %242 = sbr.rel (%p239_p2) target bundleno = 719 (0x2cf), region = 48  ;;  %p271_p3 = scmp.lt.s32.totalorder (!%p239_p2), %s946_s28, 31  ;;  %1023 = vmatprep.subr.bf16.mxu0 (!%p239_p2), %v1115_v0  ;;  %v1117_v2 = vld [vmem:[%s1381_s3] sm:$0xff] (!%p239_p2)   ;;  %v1118_v3 = vld [vmem:[%s1381_s3 + $0x8] sm:$0xff] (!%p239_p2)   ;;  %v1120_v14 = vld [vmem:[%s1381_s3 + $0x18] sm:$0xff] (!%p239_p2)  }
   0x7   : > { %1024 = vmatpush3.bf16.msra.mxu0 (!%p239_p2), %v1115_v0  ;;  %1043 = vmatprep.subr.bf16.mxu1 (!%p239_p2), %v1117_v2  ;;  %v1121_v18 = vld [vmem:[%s1381_s3 + $0x20] sm:$0xff] (!%p239_p2)   ;;  %v1122_v22 = vld [vmem:[%s1381_s3 + $0x28] sm:$0xff] (!%p239_p2)   ;;  %v1123_v32 = vld [vmem:[%s1381_s3 + $0x30] sm:$0xff] (!%p239_p2)  }
   0x8   : > { %1025 = vmatprep.subr.bf16.mxu0 (!%p239_p2), %v1116_v1  ;;  %1044 = vmatpush3.bf16.msra.mxu1 (!%p239_p2), %v1117_v2  ;;  %v1124_v33 = vld [vmem:[%s1381_s3 + $0x38] sm:$0xff] (!%p239_p2)   ;;  %v1125_v34 = vld [vmem:[%s1383_s5] sm:$0xff] (!%p239_p2)   ;;  %v1126_v35 = vld [vmem:[%s1383_s5 + $0x8] sm:$0xff] (!%p239_p2)  }
   0x9   : > { %1045 = vmatprep.subr.bf16.mxu1 (!%p239_p2), %v1118_v3  ;;  %v1127_v36 = vld [vmem:[%s1383_s5 + $0x10] sm:$0xff] (!%p239_p2)   ;;  %v1128_v37 = vld [vmem:[%s1383_s5 + $0x18] sm:$0xff] (!%p239_p2)   ;;  %v1129_v38 = vld [vmem:[%s1383_s5 + $0x20] sm:$0xff] (!%p239_p2)  }
   0xa   : > { %v1130_v39 = vld [vmem:[%s1383_s5 + $0x28] sm:$0xff] (!%p239_p2)   ;;  %v950_v40 = vld [vmem:[%s1380_s2] ss:$0 sm:$0xff] (!%p239_p2) }
   0xb   : > { %1026 = vmatpush3.bf16.msra.mxu0 (!%p239_p2), %v1116_v1 }
   0xc   : > { %1046 = vmatpush3.bf16.msra.mxu1 (!%p239_p2), %v1118_v3  ;;  %1075 = vmatprep.subr.bf16.mxu0 (!%p239_p2), %v1125_v34 }
   0xd   : > { %s1387_s28 = smov (!%p271_p3, %s946_s28), 31  ;;  %1047 = vmatprep.subr.bf16.mxu1 %v1119_v4 }
   0xe   : > { %s947_s12 = sshll.u32 %s1387_s28, 3 }
   0xf   : > { %s1241_s15 = scalar_lea.vmem %s1378_s0, %s947_s12  ;;  %s1333_s11 = scalar_lea.vmem %s1385_s7, %s947_s12 }
  0x10   : > { %v283_v5 = vld [vmem:[%s1241_s15] sm:$0xff]  ;;  %v284_v6 = vld [vmem:[%s1241_s15 + $0x8] sm:$0xff]  ;;  %v285_v7 = vld [vmem:[%s1241_s15 + $0x10] sm:$0xff]  ;;  %1048 = vmatpush3.bf16.msra.mxu1 %v1119_v4 }
  0x11   : > { %v299_v8 = vpack.c.bf16 %v284_v6, %v283_v5  ;;  %v286_v9 = vld [vmem:[%s1241_s15 + $0x18] sm:$0xff]  ;;  %v287_v10 = vld [vmem:[%s1241_s15 + $0x20] sm:$0xff]  ;;  %v288_v11 = vld [vmem:[%s1241_s15 + $0x28] sm:$0xff]  ;;  %1049 = vmatprep.subr.bf16.mxu1 %v1120_v14 }
  0x12   : > { %v300_v12 = vpack.c.bf16 %v286_v9, %v285_v7  ;;  %v301_v13 = vpack.c.bf16 %v288_v11, %v287_v10  ;;  %v289_v15 = vld [vmem:[%s1241_s15 + $0x30] sm:$0xff]  ;;  %v290_v16 = vld [vmem:[%s1241_s15 + $0x38] sm:$0xff]  ;;  %v291_v17 = vld [vmem:[%s1241_s15 + $0x40] sm:$0xff] }
  0x13   : > { %1027 = vmatprep.mubr.msk.bf16.mxu0 %vm330_vm0, %v299_v8  ;;  %v292_v19 = vld [vmem:[%s1241_s15 + $0x48] sm:$0xff]  ;;  %v302_v20 = vpack.c.bf16 %v290_v16, %v289_v15  ;;  %v293_v23 = vld [vmem:[%s1241_s15 + $0x50] sm:$0xff]  ;;  %v294_v24 = vld [vmem:[%s1241_s15 + $0x58] sm:$0xff] }
  0x14   : > { %1028 = vmatmul.mubr.msk.bf16.vlgmr.msra.gmra.mrb[0].mxu0 %vm330_vm0, %v300_v12  ;;  %v303_v21 = vpack.c.bf16 %v292_v19, %v291_v17  ;;  %1050 = vmatpush3.bf16.msra.mxu1 %v1120_v14  ;;  %v295_v25 = vld [vmem:[%s1241_s15 + $0x60] sm:$0xff]  ;;  %v296_v26 = vld [vmem:[%s1241_s15 + $0x68] sm:$0xff]  ;;  %v304_v27 = vpack.c.bf16 %v294_v24, %v293_v23  ;;  %v297_v29 = vld [vmem:[%s1241_s15 + $0x70] sm:$0xff] }
  0x15   : > { %1031 = vmatprep.mubr.msk.bf16.mxu0 %vm330_vm0, %v301_v13  ;;  %1051 = vmatprep.subr.bf16.mxu1 %v1121_v18  ;;  %v305_v28 = vpack.c.bf16 %v296_v26, %v295_v25  ;;  %v298_v30 = vld [vmem:[%s1241_s15 + $0x78] sm:$0xff] }
  0x16   : > { %v306_v31 = vpack.c.bf16 %v298_v30, %v297_v29  ;;  %1076 = vmatpush3.bf16.msra.mxu0 %v1125_v34  ;;  %v1132_v34 = vld [vmem:[%s1383_s5 + $0x38] sm:$0xff]  }
  0x17   : > { %1077 = vmatprep.subr.bf16.mxu0 %v1126_v35 }
  0x18   : > { %1052 = vmatpush3.bf16.msra.mxu1 %v1121_v18 }
  0x19   : > { %1053 = vmatprep.subr.bf16.mxu1 %v1122_v22 }
  0x1a   : > { %1078 = vmatpush3.bf16.msra.mxu0 %v1126_v35  ;;  %v961_v35 = vld [vmem:[%s1382_s4] ss:$0 sm:$0xff] }
  0x1b   : > { %1079 = vmatprep.subr.bf16.mxu0 %v1127_v36 }
  0x1c   : > { %1032 = vmatmul.mubr.msk.bf16.gmra.mrb[4].mxu0 %vm330_vm0, %v302_v20  ;;  %1054 = vmatpush3.bf16.msra.mxu1 %v1122_v22 }
  0x1d   : > { %1035 = vmatprep.mubr.msk.bf16.mxu0 %vm330_vm0, %v303_v21  ;;  %1055 = vmatprep.subr.bf16.mxu1 %v1123_v32 }
  0x1e   : > { %1080 = vmatpush3.bf16.msra.mxu0 %v1127_v36 }
  0x1f   : > { %1081 = vmatprep.subr.bf16.mxu0 %v1128_v37 }
  0x20   : > { %1056 = vmatpush3.bf16.msra.mxu1 %v1123_v32 }
  0x21   : > { %1057 = vmatprep.subr.bf16.mxu1 %v1124_v33 }
  0x22   : > { %1082 = vmatpush3.bf16.msra.mxu0 %v1128_v37 }
  0x23   : > { %1083 = vmatprep.subr.bf16.mxu0 %v1129_v38 }
  0x24   : > { %1036 = vmatmul.mubr.msk.bf16.gmra.mrb[8].mxu0 %vm330_vm0, %v304_v27  ;;  %1058 = vmatpush3.bf16.msra.mxu1 %v1124_v33  ;;  %v1131_v33 = vld [vmem:[%s1383_s5 + $0x30] sm:$0xff]  }
  0x25   : > { %1039 = vmatprep.mubr.msk.bf16.mxu0 %vm330_vm0, %v305_v28 }
  0x26   : > { %1084 = vmatpush3.bf16.msra.mxu0 %v1129_v38 }
  0x27   : > { %1085 = vmatprep.subr.bf16.mxu0 %v1130_v39 }
  0x2a   : > { %1086 = vmatpush3.bf16.msra.mxu0 %v1130_v39 }
  0x2b   : > { %1087 = vmatprep.subr.bf16.mxu0 %v1131_v33 }
  0x2c   : > { %1040 = vmatmul.mubr.msk.bf16.gmra.mrb[12].mxu0 %vm330_vm0, %v306_v31 }
  0x2e   : > { %1088 = vmatpush3.bf16.msra.mxu0 %v1131_v33 }
  0x2f   : > { %1089 = vmatprep.subr.bf16.mxu0 %v1132_v34 }
  0x32   : > { %1090 = vmatpush3.bf16.msra.mxu0 %v1132_v34 }
  0xe7   : > { %v1029_v41 = vpop.f32.mrb[0].mxu0 }
  0xe8   : > { %v398_v42 = vadd.f32 %v1029_v41, %v950_v40  ;;  %v389_v43 = vpop.f32.mrb[1].mxu0 }
  0xe9   : > { %v390_v44 = vadd.f32 %v950_v40, %v389_v43  ;;  %v1030_v45 = vpop.f32.mrb[2].mxu0 }
  0xea   : > { %v401_v46 = vadd.f32 %v1030_v45, %v950_v40  ;;  %v392_v47 = vpop.f32.mrb[3].mxu0  ;;  %v454_v49 = vmax.f32 %v398_v42, 0.0 }
  0xeb   : > { %v393_v48 = vadd.f32 %v950_v40, %v392_v47  ;;  %v452_v51 = vmax.f32 %v390_v44, 0.0 }
  0xec   : > { %v455_v50 = vmax.f32 %v401_v46, 0.0 }
  0xed   : > { %v453_v52 = vmax.f32 %v393_v48, 0.0 }
  0xee   : > { %v469_v53 = vpack.c.bf16 %v455_v50, %v454_v49 }
  0xef   : > { %v1033_v54 = vpop.f32.mrb[4].mxu0  ;;  %v468_v55 = vpack.c.bf16 %v453_v52, %v452_v51 }
  0xf0   : > { %v414_v56 = vadd.f32 %v1033_v54, %v950_v40  ;;  %v405_v57 = vpop.f32.mrb[5].mxu0 }
  0xf1   : > { %v406_v58 = vadd.f32 %v950_v40, %v405_v57  ;;  %v1034_v59 = vpop.f32.mrb[6].mxu0  ;;  %1059 = vmatprep.mubr.bf16.mxu1 %v468_v55 }
  0xf2   : > { %v417_v60 = vadd.f32 %v1034_v59, %v950_v40  ;;  %v408_v61 = vpop.f32.mrb[7].mxu0  ;;  %1060 = vmatmul.mubr.bf16.vlgmr.msra.gmra.mrb[0].mxu1 %v469_v53  ;;  %v458_v63 = vmax.f32 %v414_v56, 0.0 }
  0xf3   : > { %v409_v62 = vadd.f32 %v950_v40, %v408_v61  ;;  %v456_v1 = vmax.f32 %v406_v58, 0.0 }
  0xf4   : > { %v459_v0 = vmax.f32 %v417_v60, 0.0 }
  0xf5   : > { %v457_v2 = vmax.f32 %v409_v62, 0.0 }
  0xf6   : > { %v471_v3 = vpack.c.bf16 %v459_v0, %v458_v63 }
  0xf7   : > { %v470_v4 = vpack.c.bf16 %v457_v2, %v456_v1  ;;  %v1037_v5 = vpop.f32.mrb[8].mxu0 }
  0xf8   : > { %v430_v6 = vadd.f32 %v1037_v5, %v950_v40  ;;  %v421_v7 = vpop.f32.mrb[9].mxu0 }
  0xf9   : > { %v422_v8 = vadd.f32 %v950_v40, %v421_v7  ;;  %v1038_v9 = vpop.f32.mrb[10].mxu0  ;;  %1063 = vmatprep.mubr.bf16.mxu1 %v470_v4 }
  0xfa   : > { %v433_v10 = vadd.f32 %v1038_v9, %v950_v40  ;;  %v424_v11 = vpop.f32.mrb[11].mxu0  ;;  %1064 = vmatmul.mubr.bf16.gmra.mrb[4].mxu1 %v471_v3  ;;  %v462_v13 = vmax.f32 %v430_v6, 0.0 }
  0xfb   : > { %v425_v12 = vadd.f32 %v950_v40, %v424_v11  ;;  %v460_v15 = vmax.f32 %v422_v8, 0.0 }
  0xfc   : > { %v463_v14 = vmax.f32 %v433_v10, 0.0 }
  0xfd   : > { %v461_v16 = vmax.f32 %v425_v12, 0.0 }
  0xfe   : > { %v473_v17 = vpack.c.bf16 %v463_v14, %v462_v13 }
  0xff   : > { %v472_v18 = vpack.c.bf16 %v461_v16, %v460_v15  ;;  %v1041_v19 = vpop.f32.mrb[12].mxu0 }
 0x100   : > { %v446_v20 = vadd.f32 %v1041_v19, %v950_v40  ;;  %v437_v21 = vpop.f32.mrb[13].mxu0 }
 0x101   : > { %v438_v22 = vadd.f32 %v950_v40, %v437_v21  ;;  %v1042_v23 = vpop.f32.mrb[14].mxu0  ;;  %1067 = vmatprep.mubr.bf16.mxu1 %v472_v18 }
 0x102   : > { %v449_v24 = vadd.f32 %v1042_v23, %v950_v40  ;;  %v440_v25 = vpop.f32.mrb[15].mxu0  ;;  %1068 = vmatmul.mubr.bf16.gmra.mrb[8].mxu1 %v473_v17  ;;  %v466_v27 = vmax.f32 %v446_v20, 0.0 }
 0x103   : > { %v441_v26 = vadd.f32 %v950_v40, %v440_v25  ;;  %v464_v29 = vmax.f32 %v438_v22, 0.0 }
 0x104   : > { %v467_v28 = vmax.f32 %v449_v24, 0.0 }
 0x105   : > { %v465_v30 = vmax.f32 %v441_v26, 0.0 }
 0x106   : > { %v475_v31 = vpack.c.bf16 %v467_v28, %v466_v27  ;;  %v1318_v28 = vld [vmem:[%s1384_s6] ss:$0 sm:$0xff] }
 0x107   : > { %v474_v32 = vpack.c.bf16 %v465_v30, %v464_v29 }
 0x109   : > { %1071 = vmatprep.mubr.bf16.mxu1 %v474_v32 }
 0x10a   : > { %1072 = vmatmul.mubr.bf16.gmra.mrb[12].mxu1 %v475_v31 }
 0x1c5   : > { %v1061_v36 = vpop.f32.mrb[0].mxu1 }
 0x1c6   : > { %v590_v37 = vadd.f32 %v1061_v36, %v961_v35  ;;  %v581_v38 = vpop.f32.mrb[1].mxu1 }
 0x1c7   : > { %v582_v39 = vadd.f32 %v961_v35, %v581_v38  ;;  %v1062_v40 = vpop.f32.mrb[2].mxu1 }
 0x1c8   : > { %v593_v41 = vadd.f32 %v1062_v40, %v961_v35  ;;  %v584_v42 = vpop.f32.mrb[3].mxu1  ;;  %v646_v44 = vmax.f32 %v590_v37, 0.0 }
 0x1c9   : > { %v585_v43 = vadd.f32 %v961_v35, %v584_v42  ;;  %v644_v46 = vmax.f32 %v582_v39, 0.0 }
 0x1ca   : > { %v647_v45 = vmax.f32 %v593_v41, 0.0 }
 0x1cb   : > { %v645_v47 = vmax.f32 %v585_v43, 0.0 }
 0x1cc   : > { %v661_v48 = vpack.c.bf16 %v647_v45, %v646_v44 }
 0x1cd   : > { %v660_v49 = vpack.c.bf16 %v645_v47, %v644_v46  ;;  %v1065_v50 = vpop.f32.mrb[4].mxu1 }
 0x1ce   : > { %v606_v51 = vadd.f32 %v1065_v50, %v961_v35  ;;  %v597_v52 = vpop.f32.mrb[5].mxu1 }
 0x1cf   : > { %v598_v53 = vadd.f32 %v961_v35, %v597_v52  ;;  %v1066_v54 = vpop.f32.mrb[6].mxu1  ;;  %1091 = vmatprep.mubr.bf16.mxu0 %v660_v49 }
 0x1d0   : > { %v609_v55 = vadd.f32 %v1066_v54, %v961_v35  ;;  %v600_v56 = vpop.f32.mrb[7].mxu1  ;;  %1092 = vmatmul.mubr.bf16.vlgmr.msra.gmra.mrb[16].mxu0 %v661_v48  ;;  %v650_v58 = vmax.f32 %v606_v51, 0.0 }
 0x1d1   : > { %v601_v57 = vadd.f32 %v961_v35, %v600_v56  ;;  %v648_v60 = vmax.f32 %v598_v53, 0.0 }
 0x1d2   : > { %v651_v59 = vmax.f32 %v609_v55, 0.0 }
 0x1d3   : > { %v649_v61 = vmax.f32 %v601_v57, 0.0 }
 0x1d4   : > { %v663_v62 = vpack.c.bf16 %v651_v59, %v650_v58 }
 0x1d5   : > { %v662_v63 = vpack.c.bf16 %v649_v61, %v648_v60  ;;  %v1069_v0 = vpop.f32.mrb[8].mxu1 }
 0x1d6   : > { %v622_v1 = vadd.f32 %v1069_v0, %v961_v35  ;;  %v613_v2 = vpop.f32.mrb[9].mxu1 }
 0x1d7   : > { %v614_v3 = vadd.f32 %v961_v35, %v613_v2  ;;  %v1070_v4 = vpop.f32.mrb[10].mxu1  ;;  %1095 = vmatprep.mubr.bf16.mxu0 %v662_v63 }
 0x1d8   : > { %v625_v5 = vadd.f32 %v1070_v4, %v961_v35  ;;  %v616_v6 = vpop.f32.mrb[11].mxu1  ;;  %1096 = vmatmul.mubr.bf16.gmra.mrb[20].mxu0 %v663_v62  ;;  %v654_v8 = vmax.f32 %v622_v1, 0.0 }
 0x1d9   : > { %v617_v7 = vadd.f32 %v961_v35, %v616_v6  ;;  %v652_v10 = vmax.f32 %v614_v3, 0.0 }
 0x1da   : > { %v655_v9 = vmax.f32 %v625_v5, 0.0 }
 0x1db   : > { %v653_v11 = vmax.f32 %v617_v7, 0.0 }
 0x1dc   : > { %v665_v12 = vpack.c.bf16 %v655_v9, %v654_v8 }
 0x1dd   : > { %v664_v13 = vpack.c.bf16 %v653_v11, %v652_v10  ;;  %v1073_v14 = vpop.f32.mrb[12].mxu1 }
 0x1de   : > { %v638_v15 = vadd.f32 %v1073_v14, %v961_v35  ;;  %v629_v16 = vpop.f32.mrb[13].mxu1 }
 0x1df   : > { %v630_v17 = vadd.f32 %v961_v35, %v629_v16  ;;  %v1074_v18 = vpop.f32.mrb[14].mxu1  ;;  %1099 = vmatprep.mubr.bf16.mxu0 %v664_v13 }
 0x1e0   : > { %v641_v19 = vadd.f32 %v1074_v18, %v961_v35  ;;  %v632_v20 = vpop.f32.mrb[15].mxu1  ;;  %1100 = vmatmul.mubr.bf16.gmra.mrb[24].mxu0 %v665_v12  ;;  %v658_v22 = vmax.f32 %v638_v15, 0.0 }
 0x1e1   : > { %v633_v21 = vadd.f32 %v961_v35, %v632_v20  ;;  %v656_v24 = vmax.f32 %v630_v17, 0.0 }
 0x1e2   : > { %v659_v23 = vmax.f32 %v641_v19, 0.0 }
 0x1e3   : > { %v657_v25 = vmax.f32 %v633_v21, 0.0 }
 0x1e4   : > { %v667_v26 = vpack.c.bf16 %v659_v23, %v658_v22 }
 0x1e5   : > { %v666_v27 = vpack.c.bf16 %v657_v25, %v656_v24 }
 0x1e7   : > { %1103 = vmatprep.mubr.bf16.mxu0 %v666_v27 }
 0x1e8   : > { %1104 = vmatmul.mubr.bf16.gmra.mrb[28].mxu0 %v667_v26 }
 0x2a3   : > { %v1093_v29 = vpop.f32.mrb[16].mxu0 }
 0x2a4   : > { %v782_v30 = vadd.f32 %v1093_v29, %v1318_v28  ;;  %v773_v31 = vpop.f32.mrb[17].mxu0 }
 0x2a5   : > { %v774_v32 = vadd.f32 %v1318_v28, %v773_v31  ;;  %v1094_v33 = vpop.f32.mrb[18].mxu0 }
 0x2a6   : > { %1133 = vtanh.f32 %v782_v30  ;;  %v785_v34 = vadd.f32 %v1094_v33, %v1318_v28  ;;  %v776_v35 = vpop.f32.mrb[19].mxu0 }
 0x2a7   : > { %1135 = vtanh.f32 %v774_v32  ;;  %v777_v36 = vadd.f32 %v1318_v28, %v776_v35 }
 0x2a8   : > { %1137 = vtanh.f32 %v785_v34 }
 0x2a9   : > { %1139 = vtanh.f32 %v777_v36 }
 0x2ab   : > { %v1097_v37 = vpop.f32.mrb[20].mxu0 }
 0x2ac   : > { %v798_v38 = vadd.f32 %v1097_v37, %v1318_v28  ;;  %v789_v39 = vpop.f32.mrb[21].mxu0 }
 0x2ad   : > { %v790_v40 = vadd.f32 %v1318_v28, %v789_v39  ;;  %v1098_v41 = vpop.f32.mrb[22].mxu0 }
 0x2ae   : > { %1141 = vtanh.f32 %v798_v38  ;;  %v801_v42 = vadd.f32 %v1098_v41, %v1318_v28  ;;  %v792_v43 = vpop.f32.mrb[23].mxu0 }
 0x2af   : > { %1143 = vtanh.f32 %v790_v40  ;;  %v793_v44 = vadd.f32 %v1318_v28, %v792_v43 }
 0x2b0   : > { %v1134_v45 = vpop.eup %1133  ;;  %1145 = vtanh.f32 %v801_v42 }
 0x2b1   : > { %v1136_v46 = vpop.eup %1135  ;;  %v854_v47 = vmul.f32 2.0, %v1134_v45  ;;  %1147 = vtanh.f32 %v793_v44 }
 0x2b2   : > { %v1138_v48 = vpop.eup %1137  ;;  %v852_v49 = vmul.f32 2.0, %v1136_v46 }
 0x2b3   : > { %v1140_v50 = vpop.eup %1139  ;;  %871 = vst.msk [vmem:[%s1333_s11 + $0x10] sm:$0xff] %vm868_vm1, %v854_v47  ;;  %v855_v51 = vmul.f32 2.0, %v1138_v48  ;;  %v1101_v52 = vpop.f32.mrb[24].mxu0 }
 0x2b4   : > { %869 = vst.msk [vmem:[%s1333_s11] sm:$0xff] %vm868_vm1, %v852_v49  ;;  %v853_v53 = vmul.f32 2.0, %v1140_v50  ;;  %v814_v54 = vadd.f32 %v1101_v52, %v1318_v28  ;;  %v805_v55 = vpop.f32.mrb[25].mxu0 }
 0x2b5   : > { %872 = vst.msk [vmem:[%s1333_s11 + $0x18] sm:$0xff] %vm868_vm1, %v855_v51  ;;  %v806_v56 = vadd.f32 %v1318_v28, %v805_v55  ;;  %v1102_v57 = vpop.f32.mrb[26].mxu0 }
 0x2b6   : > { %870 = vst.msk [vmem:[%s1333_s11 + $0x8] sm:$0xff] %vm868_vm1, %v853_v53  ;;  %1149 = vtanh.f32 %v814_v54  ;;  %v817_v58 = vadd.f32 %v1102_v57, %v1318_v28  ;;  %v808_v59 = vpop.f32.mrb[27].mxu0 }
 0x2b7   : > { %1151 = vtanh.f32 %v806_v56  ;;  %v809_v60 = vadd.f32 %v1318_v28, %v808_v59 }
 0x2b8   : > { %v1142_v61 = vpop.eup %1141  ;;  %1153 = vtanh.f32 %v817_v58 }
 0x2b9   : > { %v1144_v62 = vpop.eup %1143  ;;  %v858_v63 = vmul.f32 2.0, %v1142_v61  ;;  %1155 = vtanh.f32 %v809_v60 }
 0x2ba   : > { %v1146_v0 = vpop.eup %1145  ;;  %v856_v1 = vmul.f32 2.0, %v1144_v62 }
 0x2bb   : > { %v1148_v2 = vpop.eup %1147  ;;  %875 = vst.msk [vmem:[%s1333_s11 + $0x30] sm:$0xff] %vm868_vm1, %v858_v63  ;;  %v859_v3 = vmul.f32 2.0, %v1146_v0  ;;  %v1105_v4 = vpop.f32.mrb[28].mxu0 }
 0x2bc   : > { %873 = vst.msk [vmem:[%s1333_s11 + $0x20] sm:$0xff] %vm868_vm1, %v856_v1  ;;  %v857_v5 = vmul.f32 2.0, %v1148_v2  ;;  %v830_v6 = vadd.f32 %v1105_v4, %v1318_v28  ;;  %v821_v7 = vpop.f32.mrb[29].mxu0 }
 0x2bd   : > { %876 = vst.msk [vmem:[%s1333_s11 + $0x38] sm:$0xff] %vm868_vm1, %v859_v3  ;;  %v822_v8 = vadd.f32 %v1318_v28, %v821_v7  ;;  %v1106_v9 = vpop.f32.mrb[30].mxu0 }
 0x2be   : > { %874 = vst.msk [vmem:[%s1333_s11 + $0x28] sm:$0xff] %vm868_vm1, %v857_v5  ;;  %1157 = vtanh.f32 %v830_v6  ;;  %v833_v10 = vadd.f32 %v1106_v9, %v1318_v28  ;;  %v824_v11 = vpop.f32.mrb[31].mxu0 }
 0x2bf   : > { %1159 = vtanh.f32 %v822_v8  ;;  %v825_v12 = vadd.f32 %v1318_v28, %v824_v11 }
 0x2c0   : > { %v1150_v13 = vpop.eup %1149  ;;  %1161 = vtanh.f32 %v833_v10 }
 0x2c1   : > { %v1152_v14 = vpop.eup %1151  ;;  %v862_v15 = vmul.f32 2.0, %v1150_v13  ;;  %1163 = vtanh.f32 %v825_v12 }
 0x2c2   : > { %v1154_v16 = vpop.eup %1153  ;;  %v860_v17 = vmul.f32 2.0, %v1152_v14 }
 0x2c3   : > { %v1156_v18 = vpop.eup %1155  ;;  %879 = vst.msk [vmem:[%s1333_s11 + $0x50] sm:$0xff] %vm868_vm1, %v862_v15  ;;  %v863_v19 = vmul.f32 2.0, %v1154_v16 }
 0x2c4   : > { %877 = vst.msk [vmem:[%s1333_s11 + $0x40] sm:$0xff] %vm868_vm1, %v860_v17  ;;  %v861_v20 = vmul.f32 2.0, %v1156_v18 }
 0x2c5   : > { %880 = vst.msk [vmem:[%s1333_s11 + $0x58] sm:$0xff] %vm868_vm1, %v863_v19 }
 0x2c6   : > { %878 = vst.msk [vmem:[%s1333_s11 + $0x48] sm:$0xff] %vm868_vm1, %v861_v20 }
 0x2c8   : > { %v1158_v21 = vpop.eup %1157 }
 0x2c9   : > { %v1160_v22 = vpop.eup %1159  ;;  %v866_v23 = vmul.f32 2.0, %v1158_v21 }
 0x2ca   : > { %v1162_v24 = vpop.eup %1161  ;;  %v864_v25 = vmul.f32 2.0, %v1160_v22 }
 0x2cb   : > { %v1164_v26 = vpop.eup %1163  ;;  %883 = vst.msk [vmem:[%s1333_s11 + $0x70] sm:$0xff] %vm868_vm1, %v866_v23  ;;  %v867_v27 = vmul.f32 2.0, %v1162_v24 }
 0x2cc   : > { %881 = vst.msk [vmem:[%s1333_s11 + $0x60] sm:$0xff] %vm868_vm1, %v864_v25  ;;  %v865_v28 = vmul.f32 2.0, %v1164_v26 }
 0x2cd   : > { %884 = vst.msk [vmem:[%s1333_s11 + $0x78] sm:$0xff] %vm868_vm1, %v867_v27 }
 0x2ce   : > { %882 = vst.msk [vmem:[%s1333_s11 + $0x68] sm:$0xff] %vm868_vm1, %v865_v28 }
 0x2cf PF: > { %s17_s24 = sadd.s32 1, %s1171_s24  }
 0x2d0   : > { %p14_p4 = scmp.ge.s32.totalorder %s17_s24, 4  }
 0x2d2   :  { %16 = sbr.rel (!%p14_p4) target bundleno = 1 (0x1), region = 78 }

</bundles_post_ra>
